<compile_context>
chip_gen: v5e
topology: v5e:2x2
jax: 0.10.0
libtpu: 0.0.40
codegen_flags: <defaults>
</compile_context>

<pallas_src>
import functools

import jax
import jax.numpy as jnp
from jax import lax
from jax.experimental import pallas as pl
from jax.experimental.pallas import tpu as pltpu


def _round_up(x, m):
    return (x + m - 1) // m * m


def triplet_loss_kernel(a_b_ref, n_b_ref, p_b_ref,        # (1, TILE_N) int32
                        a_ref, n_ref, p_ref,              # (TILE_N, D) f32
                        a_gt_ref, n_gt_ref, p_gt_ref,     # (B, 1) f32
                        out_ref,                          # (1, 1) f32 VMEM
                        acc_a, acc_n, acc_p,              # (B, D) f32 VMEM scratch
                        *, num_graphs, margin, eps):
    i = pl.program_id(0)

    @pl.when(i == 0)
    def _init():
        acc_a[...] = jnp.zeros_like(acc_a)
        acc_n[...] = jnp.zeros_like(acc_n)
        acc_p[...] = jnp.zeros_like(acc_p)

    tile_n = a_b_ref.shape[1]
    # Lane-dense one-hot: graph id on sublanes, node index on lanes -> (B, TILE_N).
    graph_ids = lax.broadcasted_iota(jnp.int32, (num_graphs, tile_n), 0)

    def pool_tile(batch_row, x):
        # batch_row: (1, TILE_N); padded nodes carry -1 and match no graph.
        onehot = (batch_row == graph_ids).astype(jnp.float32)            # (B, TILE_N)
        return jnp.dot(onehot, x, preferred_element_type=jnp.float32)    # (B, D)

    acc_a[...] += pool_tile(a_b_ref[...], a_ref[...])
    acc_n[...] += pool_tile(n_b_ref[...], n_ref[...])
    acc_p[...] += pool_tile(p_b_ref[...], p_ref[...])

    @pl.when(i == pl.num_programs(0) - 1)
    def _finalize():
        anc = acc_a[...]
        neg = acc_n[...]
        pos = acc_p[...]
        # torch.linalg.norm(..., dim=1)
        pos_d = jnp.sqrt(jnp.sum((pos - anc) ** 2, axis=1, keepdims=True))   # (B, 1)
        neg_d = jnp.sqrt(jnp.sum((neg - anc) ** 2, axis=1, keepdims=True))   # (B, 1)
        coeff = jnp.abs(n_gt_ref[...] - a_gt_ref[...]) / (
            jnp.abs(p_gt_ref[...] - a_gt_ref[...]) + eps)                    # (B, 1)
        loss = jnp.maximum(pos_d - coeff * neg_d + margin, 0.0)              # (B, 1)
        # mean over graphs -> (1, 1)
        out_ref[...] = jnp.sum(loss, axis=0, keepdims=True) * (1.0 / num_graphs)


def triplet_loss_regression(anchor_batch, negative_batch, positive_batch,
                            anchor, negative, positive,
                            anchor_gt, negative_gt, positive_gt,
                            margin=0.0, eps=1e-6, tile_n=512):
    num_graphs = int(anchor_gt.shape[0])
    d = int(anchor.shape[1])

    a = anchor.astype(jnp.float32)
    n = negative.astype(jnp.float32)
    p = positive.astype(jnp.float32)
    a_b = jnp.asarray(anchor_batch, jnp.int32).reshape(1, -1)
    n_b = jnp.asarray(negative_batch, jnp.int32).reshape(1, -1)
    p_b = jnp.asarray(positive_batch, jnp.int32).reshape(1, -1)
    a_gt = jnp.asarray(anchor_gt, jnp.float32).reshape(-1, 1)
    n_gt = jnp.asarray(negative_gt, jnp.float32).reshape(-1, 1)
    p_gt = jnp.asarray(positive_gt, jnp.float32).reshape(-1, 1)

    # Node-axis tiling: tile must be a multiple of 128 (lane width of the
    # (1, TILE_N) index blocks, sublane multiple for the (TILE_N, D) blocks).
    n_max = max(a.shape[0], n.shape[0], p.shape[0])
    tile_n = min(int(tile_n), _round_up(n_max, 128))
    tile_n = _round_up(tile_n, 128)
    n_pad = _round_up(n_max, tile_n)
    num_tiles = n_pad // tile_n

    def pad_stream(x, b):
        extra_x = n_pad - x.shape[0]
        if extra_x:
            x = jnp.pad(x, ((0, extra_x), (0, 0)))
        extra_b = n_pad - b.shape[1]
        if extra_b:
            # -1 matches no graph id -> padded rows are masked out of the pool.
            b = jnp.pad(b, ((0, 0), (0, extra_b)), constant_values=-1)
        return x, b

    a, a_b = pad_stream(a, a_b)
    n, n_b = pad_stream(n, n_b)
    p, p_b = pad_stream(p, p_b)

    kernel = functools.partial(triplet_loss_kernel,
                               num_graphs=num_graphs,
                               margin=float(margin),
                               eps=float(eps))

    idx_spec = pl.BlockSpec((1, tile_n), lambda i: (0, i))
    emb_spec = pl.BlockSpec((tile_n, d), lambda i: (i, 0))
    gt_spec = pl.BlockSpec((num_graphs, 1), lambda i: (0, 0))

    # VMEM budget: 3 embedding streams double-buffered + 3 index streams +
    # accumulators + one-hot temporaries, with margin; stays within v7x VMEM.
    est = (3 * 2 * tile_n * d * 4 + 3 * 2 * tile_n * 4
           + 3 * num_graphs * d * 4 + 4 * num_graphs * tile_n * 4)
    vmem_limit = int(min(max(2 * est, 32 * 1024 * 1024), 64 * 1024 * 1024))

    out = pl.pallas_call(
        kernel,
        out_shape=jax.ShapeDtypeStruct((1, 1), jnp.float32),
        grid=(num_tiles,),
        in_specs=[idx_spec, idx_spec, idx_spec,
                  emb_spec, emb_spec, emb_spec,
                  gt_spec, gt_spec, gt_spec],
        out_specs=pl.BlockSpec((1, 1), lambda i: (0, 0)),
        scratch_shapes=[pltpu.VMEM((num_graphs, d), jnp.float32)] * 3,
        compiler_params=pltpu.CompilerParams(
            dimension_semantics=("arbitrary",),
            vmem_limit_bytes=vmem_limit),
    )(a_b, n_b, p_b, a, n, p, a_gt, n_gt, p_gt)
    return out[0, 0]


def _reference(anchor_batch, negative_batch, positive_batch,
               anchor, negative, positive,
               anchor_gt, negative_gt, positive_gt,
               margin=0.0, eps=1e-6):
    B = anchor_gt.shape[0]
    anc = jax.ops.segment_sum(anchor, anchor_batch, num_segments=B)
    pos = jax.ops.segment_sum(positive, positive_batch, num_segments=B)
    neg = jax.ops.segment_sum(negative, negative_batch, num_segments=B)
    pos_d = jnp.linalg.norm(pos - anc, axis=1)
    neg_d = jnp.linalg.norm(neg - anc, axis=1)
    coeff = jnp.abs(negative_gt - anchor_gt) / (jnp.abs(positive_gt - anchor_gt) + eps)
    loss = jnp.maximum(pos_d - coeff * neg_d + margin, 0.0)
    return jnp.mean(loss)


if __name__ == "__main__":
    root = jax.random.PRNGKey(0)
    key1, key2 = jax.random.split(root)

    # --- test 1: small, single tile -------------------------------------
    B, N, D = 4, 32, 32
    k = jax.random.split(key1, 6)
    anchor = jax.random.normal(k[0], (N, D), jnp.float32)
    negative = jax.random.normal(k[1], (N, D), jnp.float32)
    positive = jax.random.normal(k[2], (N, D), jnp.float32)
    batch = jnp.repeat(jnp.arange(B, dtype=jnp.int32), N // B)
    anchor_gt = jax.random.normal(k[3], (B,), jnp.float32)
    negative_gt = jax.random.normal(k[4], (B,), jnp.float32)
    positive_gt = jax.random.normal(k[5], (B,), jnp.float32)

    loss = triplet_loss_regression(batch, batch, batch,
                                   anchor, negative, positive,
                                   anchor_gt, negative_gt, positive_gt,
                                   margin=0.0, eps=1e-6)
    jax.block_until_ready(loss)
    ref = _reference(batch, batch, batch, anchor, negative, positive,
                     anchor_gt, negative_gt, positive_gt, margin=0.0, eps=1e-6)
    assert abs(float(loss) - float(ref)) < 1e-3 * max(1.0, abs(float(ref))), \
        (float(loss), float(ref))

    # --- test 2: uneven node counts, multi-tile grid, masking ------------
    B2, D2 = 4, 64
    Na, Nn, Np = 296, 280, 312
    k2 = jax.random.split(key2, 9)
    a2 = jax.random.normal(k2[0], (Na, D2), jnp.float32)
    n2 = jax.random.normal(k2[1], (Nn, D2), jnp.float32)
    p2 = jax.random.normal(k2[2], (Np, D2), jnp.float32)
    ab2 = jnp.sort(jax.random.randint(k2[3], (Na,), 0, B2)).astype(jnp.int32)
    nb2 = jnp.sort(jax.random.randint(k2[4], (Nn,), 0, B2)).astype(jnp.int32)
    pb2 = jnp.sort(jax.random.randint(k2[5], (Np,), 0, B2)).astype(jnp.int32)
    agt2 = jax.random.normal(k2[6], (B2,), jnp.float32)
    ngt2 = jax.random.normal(k2[7], (B2,), jnp.float32)
    pgt2 = jax.random.normal(k2[8], (B2,), jnp.float32)

    loss2 = triplet_loss_regression(ab2, nb2, pb2, a2, n2, p2,
                                    agt2, ngt2, pgt2,
                                    margin=0.5, eps=1e-6, tile_n=128)
    jax.block_until_ready(loss2)
    ref2 = _reference(ab2, nb2, pb2, a2, n2, p2, agt2, ngt2, pgt2,
                      margin=0.5, eps=1e-6)
    assert abs(float(loss2) - float(ref2)) < 1e-3 * max(1.0, abs(float(ref2))), \
        (float(loss2), float(ref2))

    print("KERNEL_OK")
</pallas_src>

<mosaic_0001>
module attributes {stable_mosaic.version = 11 : i64} {
  func.func @triplet_loss_kernel(%arg0: i32, %arg1: memref<1x128xi32, #tpu.memory_space<vmem>>, %arg2: memref<1x128xi32, #tpu.memory_space<vmem>>, %arg3: memref<1x128xi32, #tpu.memory_space<vmem>>, %arg4: memref<128x32xf32, #tpu.memory_space<vmem>>, %arg5: memref<128x32xf32, #tpu.memory_space<vmem>>, %arg6: memref<128x32xf32, #tpu.memory_space<vmem>>, %arg7: memref<4x1xf32, #tpu.memory_space<vmem>>, %arg8: memref<4x1xf32, #tpu.memory_space<vmem>>, %arg9: memref<4x1xf32, #tpu.memory_space<vmem>>, %arg10: memref<1x1xf32, #tpu.memory_space<vmem>>, %arg11: memref<4x32xf32, #tpu.memory_space<vmem>>, %arg12: memref<4x32xf32, #tpu.memory_space<vmem>>, %arg13: memref<4x32xf32, #tpu.memory_space<vmem>>) attributes {dimension_semantics = [#tpu.dimension_semantics<arbitrary>], iteration_bounds = array<i64: 1>, scalar_prefetch = 0 : i64, scratch_operands = 3 : i64, tpu.core_type = #tpu.core_type<tc>, window_params = [{transform_indices = @transform_0, window_bounds = array<i64: 1, 128>}, {transform_indices = @transform_1, window_bounds = array<i64: 1, 128>}, {transform_indices = @transform_2, window_bounds = array<i64: 1, 128>}, {transform_indices = @transform_3, window_bounds = array<i64: 128, 32>}, {transform_indices = @transform_4, window_bounds = array<i64: 128, 32>}, {transform_indices = @transform_5, window_bounds = array<i64: 128, 32>}, {pipeline_mode = #tpu.pipeline_mode<synchronous>, transform_indices = @transform_6, window_bounds = array<i64: 4, 1>}, {pipeline_mode = #tpu.pipeline_mode<synchronous>, transform_indices = @transform_7, window_bounds = array<i64: 4, 1>}, {pipeline_mode = #tpu.pipeline_mode<synchronous>, transform_indices = @transform_8, window_bounds = array<i64: 4, 1>}, {pipeline_mode = #tpu.pipeline_mode<synchronous>, transform_indices = @transform_9, window_bounds = array<i64: 1, 1>}]} {
    %c0_i32 = arith.constant 0 : i32
    %0 = arith.cmpi eq, %arg0, %c0_i32 : i32
    %1 = arith.extui %0 : i1 to i32
    %c0_i32_0 = arith.constant 0 : i32
    %2 = arith.cmpi ne, %1, %c0_i32_0 : i32
    scf.if %2 {
      %cst_28 = arith.constant 0.000000e+00 : f32
      %37 = vector.broadcast %cst_28 : f32 to vector<4x32xf32>
      %c0_29 = arith.constant 0 : index
      %c0_30 = arith.constant 0 : index
      %38 = vector.load %arg11[%c0_29, %c0_30] : memref<4x32xf32, #tpu.memory_space<vmem>>, vector<4x32xf32>
      tpu.vector_store %arg11[%c0_29, %c0_30], %37 {strides = array<i32>} : memref<4x32xf32, #tpu.memory_space<vmem>>, vector<4x32xf32>,
      %cst_31 = arith.constant 0.000000e+00 : f32
      %39 = vector.broadcast %cst_31 : f32 to vector<4x32xf32>
      %c0_32 = arith.constant 0 : index
      %c0_33 = arith.constant 0 : index
      %40 = vector.load %arg12[%c0_32, %c0_33] : memref<4x32xf32, #tpu.memory_space<vmem>>, vector<4x32xf32>
      tpu.vector_store %arg12[%c0_32, %c0_33], %39 {strides = array<i32>} : memref<4x32xf32, #tpu.memory_space<vmem>>, vector<4x32xf32>,
      %cst_34 = arith.constant 0.000000e+00 : f32
      %41 = vector.broadcast %cst_34 : f32 to vector<4x32xf32>
      %c0_35 = arith.constant 0 : index
      %c0_36 = arith.constant 0 : index
      %42 = vector.load %arg13[%c0_35, %c0_36] : memref<4x32xf32, #tpu.memory_space<vmem>>, vector<4x32xf32>
      tpu.vector_store %arg13[%c0_35, %c0_36], %41 {strides = array<i32>} : memref<4x32xf32, #tpu.memory_space<vmem>>, vector<4x32xf32>,
    } else {
    }
    %3 = tpu.iota {dimensions = array<i32: 0>} : vector<4x128xi32>
    %c0 = arith.constant 0 : index
    %c0_1 = arith.constant 0 : index
    %4 = vector.load %arg11[%c0, %c0_1] : memref<4x32xf32, #tpu.memory_space<vmem>>, vector<4x32xf32>
    %c0_2 = arith.constant 0 : index
    %c0_3 = arith.constant 0 : index
    %5 = vector.load %arg1[%c0_2, %c0_3] : memref<1x128xi32, #tpu.memory_space<vmem>>, vector<1x128xi32>
    %c0_4 = arith.constant 0 : index
    %c0_5 = arith.constant 0 : index
    %6 = vector.load %arg4[%c0_4, %c0_5] : memref<128x32xf32, #tpu.memory_space<vmem>>, vector<128x32xf32>
    %7 = vector.broadcast %5 : vector<1x128xi32> to vector<4x128xi32>
    %8 = arith.cmpi eq, %7, %3 : vector<4x128xi32>
    %9 = arith.extui %8 : vector<4x128xi1> to vector<4x128xi32>
    %10 = arith.sitofp %9 : vector<4x128xi32> to vector<4x128xf32>
    %cst = arith.constant dense<0.000000e+00> : vector<4x32xf32>
    %11 = tpu.matmul %10, %6, %cst {dimension_numbers = #tpu.dot_dimension_numbers<[1], [0], [0], [1], [0, 0, 1, 1], [], []>} : vector<4x128xf32>, vector<128x32xf32>, vector<4x32xf32> -> vector<4x32xf32>
    %12 = arith.addf %4, %11 : vector<4x32xf32>
    %c0_6 = arith.constant 0 : index
    %c0_7 = arith.constant 0 : index
    %13 = vector.load %arg11[%c0_6, %c0_7] : memref<4x32xf32, #tpu.memory_space<vmem>>, vector<4x32xf32>
    tpu.vector_store %arg11[%c0_6, %c0_7], %12 {strides = array<i32>} : memref<4x32xf32, #tpu.memory_space<vmem>>, vector<4x32xf32>,
    %c0_8 = arith.constant 0 : index
    %c0_9 = arith.constant 0 : index
    %14 = vector.load %arg12[%c0_8, %c0_9] : memref<4x32xf32, #tpu.memory_space<vmem>>, vector<4x32xf32>
    %c0_10 = arith.constant 0 : index
    %c0_11 = arith.constant 0 : index
    %15 = vector.load %arg2[%c0_10, %c0_11] : memref<1x128xi32, #tpu.memory_space<vmem>>, vector<1x128xi32>
    %c0_12 = arith.constant 0 : index
    %c0_13 = arith.constant 0 : index
    %16 = vector.load %arg5[%c0_12, %c0_13] : memref<128x32xf32, #tpu.memory_space<vmem>>, vector<128x32xf32>
    %17 = vector.broadcast %15 : vector<1x128xi32> to vector<4x128xi32>
    %18 = arith.cmpi eq, %17, %3 : vector<4x128xi32>
    %19 = arith.extui %18 : vector<4x128xi1> to vector<4x128xi32>
    %20 = arith.sitofp %19 : vector<4x128xi32> to vector<4x128xf32>
    %cst_14 = arith.constant dense<0.000000e+00> : vector<4x32xf32>
    %21 = tpu.matmul %20, %16, %cst_14 {dimension_numbers = #tpu.dot_dimension_numbers<[1], [0], [0], [1], [0, 0, 1, 1], [], []>} : vector<4x128xf32>, vector<128x32xf32>, vector<4x32xf32> -> vector<4x32xf32>
    %22 = arith.addf %14, %21 : vector<4x32xf32>
    %c0_15 = arith.constant 0 : index
    %c0_16 = arith.constant 0 : index
    %23 = vector.load %arg12[%c0_15, %c0_16] : memref<4x32xf32, #tpu.memory_space<vmem>>, vector<4x32xf32>
    tpu.vector_store %arg12[%c0_15, %c0_16], %22 {strides = array<i32>} : memref<4x32xf32, #tpu.memory_space<vmem>>, vector<4x32xf32>,
    %c0_17 = arith.constant 0 : index
    %c0_18 = arith.constant 0 : index
    %24 = vector.load %arg13[%c0_17, %c0_18] : memref<4x32xf32, #tpu.memory_space<vmem>>, vector<4x32xf32>
    %c0_19 = arith.constant 0 : index
    %c0_20 = arith.constant 0 : index
    %25 = vector.load %arg3[%c0_19, %c0_20] : memref<1x128xi32, #tpu.memory_space<vmem>>, vector<1x128xi32>
    %c0_21 = arith.constant 0 : index
    %c0_22 = arith.constant 0 : index
    %26 = vector.load %arg6[%c0_21, %c0_22] : memref<128x32xf32, #tpu.memory_space<vmem>>, vector<128x32xf32>
    %27 = vector.broadcast %25 : vector<1x128xi32> to vector<4x128xi32>
    %28 = arith.cmpi eq, %27, %3 : vector<4x128xi32>
    %29 = arith.extui %28 : vector<4x128xi1> to vector<4x128xi32>
    %30 = arith.sitofp %29 : vector<4x128xi32> to vector<4x128xf32>
    %cst_23 = arith.constant dense<0.000000e+00> : vector<4x32xf32>
    %31 = tpu.matmul %30, %26, %cst_23 {dimension_numbers = #tpu.dot_dimension_numbers<[1], [0], [0], [1], [0, 0, 1, 1], [], []>} : vector<4x128xf32>, vector<128x32xf32>, vector<4x32xf32> -> vector<4x32xf32>
    %32 = arith.addf %24, %31 : vector<4x32xf32>
    %c0_24 = arith.constant 0 : index
    %c0_25 = arith.constant 0 : index
    %33 = vector.load %arg13[%c0_24, %c0_25] : memref<4x32xf32, #tpu.memory_space<vmem>>, vector<4x32xf32>
    tpu.vector_store %arg13[%c0_24, %c0_25], %32 {strides = array<i32>} : memref<4x32xf32, #tpu.memory_space<vmem>>, vector<4x32xf32>,
    %c0_i32_26 = arith.constant 0 : i32
    %34 = arith.cmpi eq, %arg0, %c0_i32_26 : i32
    %35 = arith.extui %34 : i1 to i32
    %c0_i32_27 = arith.constant 0 : i32
    %36 = arith.cmpi ne, %35, %c0_i32_27 : i32
    scf.if %36 {
      %c0_28 = arith.constant 0 : index
      %c0_29 = arith.constant 0 : index
      %37 = vector.load %arg11[%c0_28, %c0_29] : memref<4x32xf32, #tpu.memory_space<vmem>>, vector<4x32xf32>
      %c0_30 = arith.constant 0 : index
      %c0_31 = arith.constant 0 : index
      %38 = vector.load %arg12[%c0_30, %c0_31] : memref<4x32xf32, #tpu.memory_space<vmem>>, vector<4x32xf32>
      %c0_32 = arith.constant 0 : index
      %c0_33 = arith.constant 0 : index
      %39 = vector.load %arg13[%c0_32, %c0_33] : memref<4x32xf32, #tpu.memory_space<vmem>>, vector<4x32xf32>
      %40 = arith.subf %39, %37 : vector<4x32xf32>
      %41 = arith.mulf %40, %40 : vector<4x32xf32>
      %cst_34 = arith.constant dense<0.000000e+00> : vector<4xf32>
      %42 = vector.multi_reduction <add>, %41, %cst_34 [1] : vector<4x32xf32> to vector<4xf32>
      %43 = vector.shape_cast %42 : vector<4xf32> to vector<4x1xf32>
      %44 = math.sqrt %43 : vector<4x1xf32>
      %45 = arith.subf %38, %37 : vector<4x32xf32>
      %46 = arith.mulf %45, %45 : vector<4x32xf32>
      %cst_35 = arith.constant dense<0.000000e+00> : vector<4xf32>
      %47 = vector.multi_reduction <add>, %46, %cst_35 [1] : vector<4x32xf32> to vector<4xf32>
      %48 = vector.shape_cast %47 : vector<4xf32> to vector<4x1xf32>
      %49 = math.sqrt %48 : vector<4x1xf32>
      %c0_36 = arith.constant 0 : index
      %c0_37 = arith.constant 0 : index
      %50 = vector.load %arg8[%c0_36, %c0_37] : memref<4x1xf32, #tpu.memory_space<vmem>>, vector<4x1xf32>
      %c0_38 = arith.constant 0 : index
      %c0_39 = arith.constant 0 : index
      %51 = vector.load %arg7[%c0_38, %c0_39] : memref<4x1xf32, #tpu.memory_space<vmem>>, vector<4x1xf32>
      %52 = arith.subf %50, %51 : vector<4x1xf32>
      %53 = math.absf %52 : vector<4x1xf32>
      %c0_40 = arith.constant 0 : index
      %c0_41 = arith.constant 0 : index
      %54 = vector.load %arg9[%c0_40, %c0_41] : memref<4x1xf32, #tpu.memory_space<vmem>>, vector<4x1xf32>
      %c0_42 = arith.constant 0 : index
      %c0_43 = arith.constant 0 : index
      %55 = vector.load %arg7[%c0_42, %c0_43] : memref<4x1xf32, #tpu.memory_space<vmem>>, vector<4x1xf32>
      %56 = arith.subf %54, %55 : vector<4x1xf32>
      %57 = math.absf %56 : vector<4x1xf32>
      %cst_44 = arith.constant 9.99999997E-7 : f32
      %58 = vector.broadcast %cst_44 : f32 to vector<4x1xf32>
      %59 = arith.addf %57, %58 : vector<4x1xf32>
      %60 = arith.divf %53, %59 : vector<4x1xf32>
      %61 = arith.mulf %60, %49 : vector<4x1xf32>
      %62 = arith.subf %44, %61 : vector<4x1xf32>
      %cst_45 = arith.constant 0.000000e+00 : f32
      %63 = vector.broadcast %cst_45 : f32 to vector<4x1xf32>
      %64 = arith.addf %62, %63 : vector<4x1xf32>
      %cst_46 = arith.constant 0.000000e+00 : f32
      %65 = vector.broadcast %cst_46 : f32 to vector<4x1xf32>
      %66 = arith.maximumf %64, %65 : vector<4x1xf32>
      %cst_47 = arith.constant dense<0.000000e+00> : vector<1xf32>
      %67 = vector.multi_reduction <add>, %66, %cst_47 [0] : vector<4x1xf32> to vector<1xf32>
      %68 = vector.shape_cast %67 : vector<1xf32> to vector<1x1xf32>
      %cst_48 = arith.constant 2.500000e-01 : f32
      %69 = vector.broadcast %cst_48 : f32 to vector<1x1xf32>
      %70 = arith.mulf %68, %69 : vector<1x1xf32>
      %c0_49 = arith.constant 0 : index
      %c0_50 = arith.constant 0 : index
      %71 = vector.load %arg10[%c0_49, %c0_50] : memref<1x1xf32, #tpu.memory_space<vmem>>, vector<1x1xf32>
      tpu.vector_store %arg10[%c0_49, %c0_50], %70 {strides = array<i32>} : memref<1x1xf32, #tpu.memory_space<vmem>>, vector<1x1xf32>,
    } else {
    }
    return
  }
  func.func @transform_0(%arg0: i32) -> (i32, i32) {
    %c0_i32 = arith.constant 0 : i32
    %c0_i32_0 = arith.constant 0 : i32
    return %c0_i32, %arg0 : i32, i32
  }
  func.func @transform_1(%arg0: i32) -> (i32, i32) {
    %c0_i32 = arith.constant 0 : i32
    %c0_i32_0 = arith.constant 0 : i32
    return %c0_i32, %arg0 : i32, i32
  }
  func.func @transform_2(%arg0: i32) -> (i32, i32) {
    %c0_i32 = arith.constant 0 : i32
    %c0_i32_0 = arith.constant 0 : i32
    return %c0_i32, %arg0 : i32, i32
  }
  func.func @transform_3(%arg0: i32) -> (i32, i32) {
    %c0_i32 = arith.constant 0 : i32
    %c0_i32_0 = arith.constant 0 : i32
    return %arg0, %c0_i32 : i32, i32
  }
  func.func @transform_4(%arg0: i32) -> (i32, i32) {
    %c0_i32 = arith.constant 0 : i32
    %c0_i32_0 = arith.constant 0 : i32
    return %arg0, %c0_i32 : i32, i32
  }
  func.func @transform_5(%arg0: i32) -> (i32, i32) {
    %c0_i32 = arith.constant 0 : i32
    %c0_i32_0 = arith.constant 0 : i32
    return %arg0, %c0_i32 : i32, i32
  }
  func.func @transform_6(%arg0: i32) -> (i32, i32) {
    %c0_i32 = arith.constant 0 : i32
    %c0_i32_0 = arith.constant 0 : i32
    %c0_i32_1 = arith.constant 0 : i32
    return %c0_i32, %c0_i32_0 : i32, i32
  }
  func.func @transform_7(%arg0: i32) -> (i32, i32) {
    %c0_i32 = arith.constant 0 : i32
    %c0_i32_0 = arith.constant 0 : i32
    %c0_i32_1 = arith.constant 0 : i32
    return %c0_i32, %c0_i32_0 : i32, i32
  }
  func.func @transform_8(%arg0: i32) -> (i32, i32) {
    %c0_i32 = arith.constant 0 : i32
    %c0_i32_0 = arith.constant 0 : i32
    %c0_i32_1 = arith.constant 0 : i32
    return %c0_i32, %c0_i32_0 : i32, i32
  }
  func.func @transform_9(%arg0: i32) -> (i32, i32) {
    %c0_i32 = arith.constant 0 : i32
    %c0_i32_0 = arith.constant 0 : i32
    %c0_i32_1 = arith.constant 0 : i32
    return %c0_i32, %c0_i32_0 : i32, i32
  }
}

</mosaic_0001>

<bundles_post_ra>
// kernel: tpu_custom_call.1
= control target key start
LH: loop header
LB: loop body
LE: loop exit
PB: predicated region body
PF: predicated region fallthrough
CT: control target
= control target key end

     0   :  { %vm37_vm0 = vcmask 257024   ;;  %v314_v8 = vmov 0.0   ;;  %s540_s0 = inlined_call_operand.vmem [shape: s32[1,128], index: 0, kind: input, shape index: {}]   ;;  %s541_s1 = inlined_call_operand.vmem [shape: s32[1,128], index: 1, kind: input, shape index: {}]   ;;  %s542_s2 = inlined_call_operand.vmem [shape: s32[1,128], index: 2, kind: input, shape index: {}]   ;;  %s543_s3 = inlined_call_operand.vmem [shape: f32[128,32], index: 3, kind: input, shape index: {}]   ;;  %s544_s4 = inlined_call_operand.vmem [shape: f32[128,32], index: 4, kind: input, shape index: {}]   ;;  %s545_s5 = inlined_call_operand.vmem [shape: f32[128,32], index: 5, kind: input, shape index: {}]   ;;  %s546_s6 = inlined_call_operand.vmem [shape: f32[4,1], index: 6, kind: input, shape index: {}]   ;;  %s547_s7 = inlined_call_operand.vmem [shape: f32[4,1], index: 7, kind: input, shape index: {}]   ;;  %s548_s8 = inlined_call_operand.vmem [shape: f32[4,1], index: 8, kind: input, shape index: {}]   ;;  %s549_s9 = inlined_call_operand.hbm [shape: f32[1,1], index: 9, kind: output, shape index: {}]  }
   0x1   :  { %v60_v0 = vld [vmem:[%s543_s3 + $0x78] sm:$0xff]  ;;  %v59_v3 = vld [vmem:[%s543_s3 + $0x70] sm:$0xff]  ;;  %v58_v6 = vld [vmem:[%s543_s3 + $0x68] sm:$0xff]  ;;  %38 = vst.msk [vmem:[#allocation2] sm:$0xf] %vm37_vm0, %v314_v8 }
   0x2   :  { %v105_v1 = vld [vmem:[%s544_s4 + $0x78] sm:$0xff]  ;;  %65 = vmatpush.msra.mxu0 %v60_v0  ;;  %v104_v4 = vld [vmem:[%s544_s4 + $0x70] sm:$0xff]  ;;  %v103_v7 = vld [vmem:[%s544_s4 + $0x68] sm:$0xff]  ;;  %39 = vst.msk [vmem:[#allocation3] sm:$0xf] %vm37_vm0, %v314_v8 }
   0x3   :  { %v149_v2 = vld [vmem:[%s545_s5 + $0x78] sm:$0xff]  ;;  %110 = vmatpush.msra.mxu1 %v105_v1  ;;  %v148_v5 = vld [vmem:[%s545_s5 + $0x70] sm:$0xff]  ;;  %v147_v9 = vld [vmem:[%s545_s5 + $0x68] sm:$0xff]  ;;  %40 = vst.msk [vmem:[#allocation4] sm:$0xf] %vm37_vm0, %v314_v8 }
   0x4   :  { %154 = vmatpush.msra.mxu2 %v149_v2  ;;  %66 = vmatpush.msra.mxu0 %v59_v3  ;;  %v57_v10 = vld [vmem:[%s543_s3 + $0x60] sm:$0xff]  ;;  %v56_v13 = vld [vmem:[%s543_s3 + $0x58] sm:$0xff]  ;;  %v55_v16 = vld [vmem:[%s543_s3 + $0x50] sm:$0xff] }
   0x5   :  { %111 = vmatpush.msra.mxu1 %v104_v4  ;;  %v102_v11 = vld [vmem:[%s544_s4 + $0x60] sm:$0xff]  ;;  %v101_v14 = vld [vmem:[%s544_s4 + $0x58] sm:$0xff]  ;;  %v100_v17 = vld [vmem:[%s544_s4 + $0x50] sm:$0xff] }
   0x6   :  { %155 = vmatpush.msra.mxu2 %v148_v5  ;;  %67 = vmatpush.msra.mxu0 %v58_v6  ;;  %v146_v12 = vld [vmem:[%s545_s5 + $0x60] sm:$0xff]  ;;  %v145_v15 = vld [vmem:[%s545_s5 + $0x58] sm:$0xff]  ;;  %v144_v18 = vld [vmem:[%s545_s5 + $0x50] sm:$0xff] }
   0x7   :  { %112 = vmatpush.msra.mxu1 %v103_v7  ;;  %v54_v19 = vld [vmem:[%s543_s3 + $0x48] sm:$0xff]  ;;  %v53_v22 = vld [vmem:[%s543_s3 + $0x40] sm:$0xff]  ;;  %v52_v25 = vld [vmem:[%s543_s3 + $0x38] sm:$0xff] }
   0x8   :  { %156 = vmatpush.msra.mxu2 %v147_v9  ;;  %68 = vmatpush.msra.mxu0 %v57_v10  ;;  %v99_v20 = vld [vmem:[%s544_s4 + $0x48] sm:$0xff]  ;;  %v98_v23 = vld [vmem:[%s544_s4 + $0x40] sm:$0xff]  ;;  %v97_v26 = vld [vmem:[%s544_s4 + $0x38] sm:$0xff] }
   0x9   :  { %113 = vmatpush.msra.mxu1 %v102_v11  ;;  %v143_v21 = vld [vmem:[%s545_s5 + $0x48] sm:$0xff]  ;;  %v142_v24 = vld [vmem:[%s545_s5 + $0x40] sm:$0xff]  ;;  %v141_v27 = vld [vmem:[%s545_s5 + $0x38] sm:$0xff] }
   0xa   :  { %157 = vmatpush.msra.mxu2 %v146_v12  ;;  %69 = vmatpush.msra.mxu0 %v56_v13  ;;  %v51_v28 = vld [vmem:[%s543_s3 + $0x30] sm:$0xff]  ;;  %v50_v31 = vld [vmem:[%s543_s3 + $0x28] sm:$0xff] }
   0xb   :  { %114 = vmatpush.msra.mxu1 %v101_v14  ;;  %v96_v29 = vld [vmem:[%s544_s4 + $0x30] sm:$0xff]  ;;  %v95_v32 = vld [vmem:[%s544_s4 + $0x28] sm:$0xff] }
   0xc   :  { %158 = vmatpush.msra.mxu2 %v145_v15  ;;  %70 = vmatpush.msra.mxu0 %v55_v16  ;;  %v140_v30 = vld [vmem:[%s545_s5 + $0x30] sm:$0xff] }
   0xd   :  { %115 = vmatpush.msra.mxu1 %v100_v17 }
   0xe   :  { %159 = vmatpush.msra.mxu2 %v144_v18  ;;  %71 = vmatpush.msra.mxu0 %v54_v19 }
   0xf   :  { %116 = vmatpush.msra.mxu1 %v99_v20 }
  0x10   :  { %160 = vmatpush.msra.mxu2 %v143_v21  ;;  %72 = vmatpush.msra.mxu0 %v53_v22 }
  0x11   :  { %117 = vmatpush.msra.mxu1 %v98_v23 }
  0x12   :  { %161 = vmatpush.msra.mxu2 %v142_v24  ;;  %73 = vmatpush.msra.mxu0 %v52_v25 }
  0x13   :  { %118 = vmatpush.msra.mxu1 %v97_v26 }
  0x14   :  { %162 = vmatpush.msra.mxu2 %v141_v27 }
  0x15   :  { %14 = vsyncpa [#allocation6], 0  ;;  %74 = vmatpush.msra.mxu0 %v51_v28  ;;  %119 = vmatpush.msra.mxu1 %v96_v29  ;;  %v139_v33 = vld [vmem:[%s545_s5 + $0x28] sm:$0xff]  ;;  %v49_v34 = vld [vmem:[%s543_s3 + $0x20] sm:$0xff]  ;;  %v41_v37 = vlaneseq  ;;  %v315_v54 = vmov 1.0   ;;  %vm243_vm12 = vcmask 3072  }
  0x16   :  { %163 = vmatpush.msra.mxu2 %v140_v30  ;;  %v94_v35 = vld [vmem:[%s544_s4 + $0x20] sm:$0xff]  ;;  %v48_v38 = vld [vmem:[%s543_s3 + $0x18] sm:$0xff]  ;;  %v47_v41 = vld [vmem:[%s543_s3 + $0x10] sm:$0xff]  ;;  %s261_s28 = sshll.u32 %s549_s9, 4  ;;  %vm252_vm13 = vcmask 0   ;;  %s262_s28 = int_to_ptr.hbm [resolvable:$true] %s261_s28 }
  0x17   :  { %75 = vmatpush.msra.mxu0 %v50_v31  ;;  %120 = vmatpush.msra.mxu1 %v95_v32  ;;  %v138_v36 = vld [vmem:[%s545_s5 + $0x20] sm:$0xff]  ;;  %v93_v39 = vld [vmem:[%s544_s4 + $0x18] sm:$0xff]  ;;  %v92_v42 = vld [vmem:[%s544_s4 + $0x10] sm:$0xff]  ;;  %v42_v45 = vshrl.u32 %v41_v37, 7 }
  0x18   :  { %164 = vmatpush.msra.mxu2 %v139_v33  ;;  %v137_v40 = vld [vmem:[%s545_s5 + $0x18] sm:$0xff]  ;;  %v136_v43 = vld [vmem:[%s545_s5 + $0x10] sm:$0xff]  ;;  %v46_v44 = vld [vmem:[%s543_s3 + $0x8] sm:$0xff] }
  0x19   :  { %76 = vmatpush.msra.mxu0 %v49_v34  ;;  %121 = vmatpush.msra.mxu1 %v94_v35  ;;  %v279_v46 = vld [vmem:[%s540_s0] ss:$0 sm:$0xff]  ;;  %v91_v47 = vld [vmem:[%s544_s4 + $0x8] sm:$0xff]  ;;  %v88_v56 = vld [vmem:[#allocation3] sm:$0xf] }
  0x1a   :  { %165 = vmatpush.msra.mxu2 %v138_v36  ;;  %v280_v48 = vld [vmem:[%s541_s1] ss:$0 sm:$0xff]  ;;  %v135_v50 = vld [vmem:[%s545_s5 + $0x8] sm:$0xff]  ;;  %vm62_vm1 = vcmp.eq.s32.totalorder %v279_v46, %v42_v45 }
  0x1b   :  { %77 = vmatpush.msra.mxu0 %v48_v38  ;;  %122 = vmatpush.msra.mxu1 %v93_v39  ;;  %v281_v49 = vld [vmem:[%s542_s2] ss:$0 sm:$0xff]  ;;  %vm107_vm2 = vcmp.eq.s32.totalorder %v280_v48, %v42_v45  ;;  %v132_v61 = vld [vmem:[#allocation4] sm:$0xf] }
  0x1c   :  { %166 = vmatpush.msra.mxu2 %v137_v40  ;;  %v45_v51 = vld [vmem:[%s543_s3] sm:$0xff]  ;;  %vm151_vm3 = vcmp.eq.s32.totalorder %v281_v49, %v42_v45 }
  0x1d   :  { %78 = vmatpush.msra.mxu0 %v47_v41  ;;  %123 = vmatpush.msra.mxu1 %v92_v42  ;;  %v90_v52 = vld [vmem:[%s544_s4] sm:$0xff] }
  0x1e   :  { %167 = vmatpush.msra.mxu2 %v136_v43  ;;  %v134_v53 = vld [vmem:[%s545_s5] sm:$0xff] }
  0x1f   :  { %79 = vmatpush.msra.mxu0 %v46_v44  ;;  %124 = vmatpush.msra.mxu1 %v91_v47  ;;  %v43_v55 = vld [vmem:[#allocation2] sm:$0xf] }
  0x20   :  { %168 = vmatpush.msra.mxu2 %v135_v50  ;;  %v217_v9 = vld [vmem:[%s546_s6] sm:$0xf] }
  0x21   :  { %80 = vmatpush.msra.mxu0 %v45_v51  ;;  %125 = vmatpush.msra.mxu1 %v90_v52  ;;  %v220_v10 = vld [vmem:[%s548_s8] sm:$0xf] }
  0x22   :  { %169 = vmatpush.msra.mxu2 %v134_v53  ;;  %271 = vmatmul.msk.f32.vlgmr.msra.gmra.mxu0 %vm62_vm1, %v315_v54  ;;  %v221_v11 = vsub.f32 %v220_v10, %v217_v9  ;;  %v216_v24 = vld [vmem:[%s547_s7] sm:$0xf]  ;;  %s316_s7 = smov [#allocation5]  }
  0x23   :  { %273 = vmatmul.msk.f32.vlgmr.msra.gmra.mxu1 %vm107_vm2, %v315_v54  ;;  %275 = vmatmul.msk.f32.vlgmr.msra.gmra.mxu2 %vm151_vm3, %v315_v54  ;;  %v218_v32 = vsub.f32 %v216_v24, %v217_v9  ;;  %s259_s25 = sshll.u32 %s316_s7, 4  ;;  %s260_s25 = int_to_ptr.vmem [resolvable:$true] %s259_s25 }
  0x24   :  { %v222_v12 = vand.u32 2147483647, %v221_v11 }
  0x25   :  { %v219_v38 = vand.u32 2147483647, %v218_v32 }
  0x26   :  { %v223_v13 = vadd.f32 1e-06, %v222_v12 }
  0x28   :  { %282 = vrcp.f32 %v223_v13  ;;  %vm229_vm4 = vweird.f32 %v223_v13  ;;  %v235_v25 = vand.u32 2147483648, %v223_v13  ;;  %v233_v28 = vand.u32 2147483647, %v223_v13 }
  0x2a   :  { %v236_v33 = vor.u32 1.1754944e-38, %v235_v25  ;;  %vm234_vm7 = vcmp.eq.f32.partialorder %v233_v28, 8.507059e+37 }
  0x2e   :  { %v283_v14 = vpop.eup %282 }
  0x2f   :  { %v225_v16 = vmul.f32 %v283_v14, %v223_v13  ;;  %vm230_vm5 = vweird.f32 %v283_v14 }
  0x30   :  { %vm231_vm6 = vmor %vm229_vm4, %vm230_vm5 }
  0x31   :  { %v226_v17 = vsub.f32 1.0, %v225_v16 }
  0x33   :  { %v227_v22 = vmul.f32 %v283_v14, %v226_v17 }
  0x35   :  { %v228_v27 = vadd.f32 %v283_v14, %v227_v22 }
  0x37   :  { %v232_v36 = vsel %vm231_vm6, %v283_v14, %v228_v27 }
  0x38   :  { %v237_v39 = vsel %vm234_vm7, %v236_v33, %v232_v36 }
  0x39   :  { %v238_v44 = vmul.f32 %v237_v39, %v219_v38 }
  0x9f   :  { %v82_v57 = vpop.f32.mrf.mxu0 }
  0xa0   :  { %v85_v58 = vadd.f32 %v82_v57, %v43_v55  ;;  %v127_v59 = vpop.f32.mrf.mxu1 }
  0xa1   :  { %v130_v60 = vadd.f32 %v127_v59, %v88_v56 }
  0xa2   :  { %87 = vst.msk [vmem:[#allocation2] sm:$0xf] %vm37_vm0, %v85_v58 }
  0xa3   :  { %131 = vst.msk [vmem:[#allocation3] sm:$0xf] %vm37_vm0, %v130_v60 }
  0xa6   :  { %v171_v62 = vpop.f32.mrf.mxu2 }
  0xa7   :  { %v174_v63 = vadd.f32 %v171_v62, %v132_v61 }
  0xa9   :  { %175 = vst.msk [vmem:[#allocation4] sm:$0xf] %vm37_vm0, %v174_v63  ;;  %v179_v0 = vld [vmem:[#allocation2] sm:$0xf] }
  0xaa   :  { %v180_v1 = vld [vmem:[#allocation3] sm:$0xf] }
  0xab   :  { %v199_v2 = vsub.f32 %v180_v1, %v179_v0 }
  0xad   :  { %v200_v3 = vmul.f32 %v199_v2, %v199_v2 }
  0xaf   :  { %v201_v4 = vsel %vm37_vm0, %v200_v3, 0.0 }
  0xb0   :  { %202 = vadd.xlane.f32.xlu0 %v201_v4  ;;  %v181_v5 = vld [vmem:[#allocation4] sm:$0xf] }
  0xb1   :  { %v182_v6 = vsub.f32 %v181_v5, %v179_v0 }
  0xb3   :  { %v183_v7 = vmul.f32 %v182_v6, %v182_v6 }
  0xb5   :  { %v184_v8 = vsel %vm37_vm0, %v183_v7, 0.0 }
  0xb8   :  { %185 = vadd.xlane.f32.xlu0 %v184_v8 }
 0x123   :  { %v203_v15 = vpop.xlane.xlu0 %202 }
 0x124   :  { %284 = vrsqrt.f32 %v203_v15  ;;  %vm211_vm8 = vcmp.eq.f32.partialorder %v203_v15, inf  ;;  %v214_v42 = vand.u32 2147483648, %v203_v15  ;;  %vm213_vm9 = vcmp.eq.f32.partialorder %v203_v15, 0.0 }
 0x12a   :  { %v285_v18 = vpop.eup %284 }
 0x12b   :  { %v205_v19 = vmul.f32 %v285_v18, %v203_v15  ;;  %v186_v20 = vpop.xlane.xlu0 %185 }
 0x12c   :  { %286 = vrsqrt.f32 %v186_v20  ;;  %vm194_vm10 = vcmp.eq.f32.partialorder %v186_v20, inf  ;;  %v197_v47 = vand.u32 2147483648, %v186_v20  ;;  %vm196_vm11 = vcmp.eq.f32.partialorder %v186_v20, 0.0 }
 0x12d   :  { %v206_v21 = vmul.f32 %v285_v18, %v205_v19 }
 0x12f   :  { %v207_v23 = vmul.f32 0.5, %v206_v21 }
 0x131   :  { %v208_v26 = vsub.f32 1.5, %v207_v23 }
 0x132   :  { %v287_v29 = vpop.eup %286 }
 0x133   :  { %v209_v30 = vmul.f32 %v285_v18, %v208_v26  ;;  %v188_v31 = vmul.f32 %v287_v29, %v186_v20 }
 0x135   :  { %v210_v34 = vmul.f32 %v209_v30, %v203_v15  ;;  %v189_v35 = vmul.f32 %v287_v29, %v188_v31 }
 0x137   :  { %v190_v37 = vmul.f32 0.5, %v189_v35  ;;  %v212_v40 = vsel %vm211_vm8, %v203_v15, %v210_v34 }
 0x138   :  { %v215_v45 = vsel %vm213_vm9, %v214_v42, %v212_v40 }
 0x139   :  { %v191_v41 = vsub.f32 1.5, %v190_v37  ;;  %v239_v49 = vmul.f32 %v238_v44, %v215_v45 }
 0x13b   :  { %v192_v43 = vmul.f32 %v287_v29, %v191_v41 }
 0x13d   :  { %v193_v46 = vmul.f32 %v192_v43, %v186_v20 }
 0x13f   :  { %v195_v48 = vsel %vm194_vm10, %v186_v20, %v193_v46 }
 0x140   :  { %v198_v50 = vsel %vm196_vm11, %v197_v47, %v195_v48 }
 0x141   :  { %v240_v51 = vsub.f32 %v198_v50, %v239_v49 }
 0x143   :  { %v242_v52 = vmax.f32 %v240_v51, 0.0 }
 0x145   :  { %v244_v53 = vsel %vm243_vm12, %v242_v52, 0.0 }
 0x146   :  { %v245_v54 = vrot.slane %v244_v53, 4 }
 0x148   :  { %v246_v55 = vadd.f32 %v245_v54, %v244_v53 }
 0x14a   :  { %v247_v56 = vrot.slane %v246_v55, 2 }
 0x14c   :  { %v248_v57 = vadd.f32 %v247_v56, %v246_v55 }
 0x14e   :  { %v249_v58 = vrot.slane %v248_v57, 1 }
 0x150   :  { %v250_v59 = vadd.f32 %v249_v58, %v248_v57 }
 0x152   :  { %v251_v60 = vmul.f32 0.25, %v250_v59 }
 0x154   :  { %253 = vst.msk [vmem:[#allocation5] sm:$0x1] %vm252_vm13, %v251_v60 }
 0x155   :  { %264 = dma.vmem_to_hbm [thread:$0]  %s260_s25, 16, %s262_s28, [#allocation6]  }
 0x156   :  { %312 = dma.done.wait [#allocation6], 16  }
 0x157   :  { %313 = vsyncadd [#allocation6], 4294967280 }
 0x158   :  { %269 = vsyncpa [#allocation6], 1 }

</bundles_post_ra>
